<compile_context>
chip_gen: v7x
topology: tpu7x:2x2x1
jax: 0.10.0
libtpu: 0.0.40
codegen_flags: <defaults>
</compile_context>

<pallas_src>
import math

import jax
import jax.numpy as jnp
from jax import lax
from jax.experimental import pallas as pl
from jax.experimental.pallas import tpu as pltpu

LANES = 128            # lane-dense minor dim -> full-width unmasked stores
_MIN_BLOCK_ROWS = 16   # multiple of 16 so the half-tile split stays 8-sublane aligned


def _cdiv(a, b):
    return -(-a // b)


def _round_up(a, m):
    return _cdiv(a, m) * m


def _mix32(h):
    """lowbias32 integer hash (full 32-bit avalanche), pure uint32 jnp ops."""
    h = h ^ (h >> jnp.uint32(16))
    h = h * jnp.uint32(0x7FEB352D)
    h = h ^ (h >> jnp.uint32(15))
    h = h * jnp.uint32(0x846CA68B)
    h = h ^ (h >> jnp.uint32(16))
    return h


def _uniform_01(key, counter):
    """Uniform [0, 1) float32 from a (key, counter) pair (24-bit resolution)."""
    h = _mix32(counter ^ key)
    h = _mix32(h + key + jnp.uint32(0x9E3779B9))
    # Top 24 bits -> exactly representable float32 in [0, 1).
    return (h >> jnp.uint32(8)).astype(jnp.int32).astype(jnp.float32) * jnp.float32(
        1.0 / (1 << 24))


def gaussian_noise_kernel(seed_ref, x_ref, o_ref):
    # seed_ref : SMEM (1,) int32 base seed (scalar prefetch)
    # x_ref    : (block_rows, 128) input tile
    # o_ref    : (block_rows, 128) output tile
    block_rows, lanes = x_ref.shape
    half = block_rows // 2

    # Per-tile key: avalanche-mix (seed, tile id) so neighbouring tiles and
    # neighbouring user seeds get decorrelated noise streams.
    seed = seed_ref[0].astype(jnp.uint32)
    tile = pl.program_id(0).astype(jnp.uint32)
    key = _mix32(seed * jnp.uint32(0x9E3779B9) + jnp.uint32(0x85EBCA6B))
    key = _mix32(key ^ (tile * jnp.uint32(0x632BE59B) + jnp.uint32(1)))

    # Two counters per half-tile element -> u1, u2 (independent draws).
    row = lax.broadcasted_iota(jnp.int32, (half, lanes), 0).astype(jnp.uint32)
    col = lax.broadcasted_iota(jnp.int32, (half, lanes), 1).astype(jnp.uint32)
    idx2 = (row * jnp.uint32(lanes) + col) * jnp.uint32(2)
    u1 = _uniform_01(key, idx2)
    u2 = _uniform_01(key, idx2 + jnp.uint32(1))

    # Dual-output Box-Muller: one (log, sqrt, cos) chain feeds BOTH halves.
    r = jnp.sqrt(-2.0 * jnp.log(1.0 - u1))          # 1-u1 in (2^-24, 1] -> finite
    c = jnp.cos((2.0 * math.pi) * u2)
    # sin(2*pi*u2) from cos: sign select + sqrt instead of a 2nd trig polynomial.
    s = jnp.where(u2 < 0.5, 1.0, -1.0) * jnp.sqrt(jnp.maximum(1.0 - c * c, 0.0))

    x = x_ref[...].astype(jnp.float32)
    o_ref[:half, :] = (x[:half, :] + r * c).astype(o_ref.dtype)
    o_ref[half:, :] = (x[half:, :] + r * s).astype(o_ref.dtype)


def gaussian_noise(x, seed, *, training=True, max_block_rows=8192):
    """Forward of GaussianNoiseLayer: x + N(0,1) in training, identity in eval."""
    if not training:
        return x                                   # module returns x untouched

    orig_shape = x.shape
    orig_dtype = x.dtype
    total = math.prod(orig_shape)
    if total == 0:
        return x

    flat = x.reshape(-1)
    # Pad only the final sliver: next multiple of 128 lanes, and at least
    # _MIN_BLOCK_ROWS rows for tiny tensors.  Aligned shapes pay no extra copy.
    padded_total = max(_round_up(total, LANES), _MIN_BLOCK_ROWS * LANES)
    if padded_total != total:
        flat = jnp.pad(flat, (0, padded_total - total))
    rows = padded_total // LANES
    x2d = flat.reshape(rows, LANES)

    # Row tile: multiple of 16, <= rows, capped by max_block_rows, and sized
    # for ~4 grid steps when the tensor is big enough (DMA pipelining +
    # megacore / v7x 2-TC sharding of the "parallel" grid axis).  Raggedness of
    # the last block is handled by the cdiv grid (no padded copy).
    block_rows = min(max_block_rows,
                     _round_up(_cdiv(rows, 4), _MIN_BLOCK_ROWS),
                     (rows // _MIN_BLOCK_ROWS) * _MIN_BLOCK_ROWS)
    block_rows = max(block_rows, _MIN_BLOCK_ROWS)
    n_tiles = _cdiv(rows, block_rows)

    seed_arr = jnp.asarray([seed], dtype=jnp.int32)

    out2d = pl.pallas_call(
        gaussian_noise_kernel,
        out_shape=jax.ShapeDtypeStruct((rows, LANES), orig_dtype),
        grid_spec=pltpu.PrefetchScalarGridSpec(
            num_scalar_prefetch=1,
            grid=(n_tiles,),
            in_specs=[pl.BlockSpec((block_rows, LANES), lambda i, seed: (i, 0))],
            out_specs=pl.BlockSpec((block_rows, LANES), lambda i, seed: (i, 0)),
        ),
        compiler_params=pltpu.CompilerParams(
            dimension_semantics=("parallel",),
            # Covers double-buffered in/out tiles (<=16 MiB f32 at 8192 rows)
            # plus elementwise noise temporaries; fits v7x's 64 MiB physical
            # VMEM and is generous on v5e/v6e (128 MiB).
            vmem_limit_bytes=48 * 1024 * 1024,
        ),
    )(seed_arr, x2d)

    out = out2d.reshape(-1)
    if padded_total != total:
        out = out[:total]
    return out.reshape(orig_shape)


if __name__ == "__main__":
    key = jax.random.PRNGKey(0)
    x = jax.random.normal(key, (2, 4, 16, 16), jnp.float32)   # NCHW, like PyTorch

    # Eval mode: identity (no kernel launched).
    y_eval = gaussian_noise(x, seed=0, training=False)
    assert y_eval.shape == x.shape

    # Train mode: x + N(0, 1).
    y = gaussian_noise(x, seed=1234, training=True)
    y = jax.block_until_ready(y)

    assert y.shape == x.shape and y.dtype == x.dtype, (y.shape, y.dtype)
    assert bool(jnp.all(jnp.isfinite(y)))

    # The added noise should be ~ standard normal (2048 samples).
    noise = (y - x).reshape(-1)
    m = float(jnp.mean(noise))
    v = float(jnp.var(noise))
    assert abs(m) < 0.2, f"noise mean {m}"
    assert 0.7 < v < 1.3, f"noise var {v}"

    print("KERNEL_OK")
</pallas_src>

<mosaic_0001>
module attributes {stable_mosaic.version = 11 : i64} {
  func.func @gaussian_noise_kernel(%arg0: i32, %arg1: memref<1xi32, #tpu.memory_space<smem>>, %arg2: memref<16x128xf32, #tpu.memory_space<vmem>>, %arg3: memref<16x128xf32, #tpu.memory_space<vmem>>) attributes {dimension_semantics = [#tpu.dimension_semantics<parallel>], iteration_bounds = array<i64: 1>, scalar_prefetch = 1 : i64, scratch_operands = 0 : i64, tpu.core_type = #tpu.core_type<tc>, window_params = [{transform_indices = @transform_0, window_bounds = array<i64: 16, 128>}, {transform_indices = @transform_1, window_bounds = array<i64: 16, 128>}]} {
    %c0 = arith.constant 0 : index
    %0 = memref.load %arg1[%c0] : memref<1xi32, #tpu.memory_space<smem>>
    %c-1640531527_i32 = arith.constant -1640531527 : i32
    %1 = arith.muli %0, %c-1640531527_i32 : i32
    %c-2048144789_i32 = arith.constant -2048144789 : i32
    %2 = arith.addi %1, %c-2048144789_i32 : i32
    %c16_i32 = arith.constant 16 : i32
    %3 = arith.shrui %2, %c16_i32 : i32
    %4 = arith.xori %2, %3 : i32
    %c2146121005_i32 = arith.constant 2146121005 : i32
    %5 = arith.muli %4, %c2146121005_i32 : i32
    %c15_i32 = arith.constant 15 : i32
    %6 = arith.shrui %5, %c15_i32 : i32
    %7 = arith.xori %5, %6 : i32
    %c-2073254261_i32 = arith.constant -2073254261 : i32
    %8 = arith.muli %7, %c-2073254261_i32 : i32
    %c16_i32_0 = arith.constant 16 : i32
    %9 = arith.shrui %8, %c16_i32_0 : i32
    %10 = arith.xori %8, %9 : i32
    %c1663821211_i32 = arith.constant 1663821211 : i32
    %11 = arith.muli %arg0, %c1663821211_i32 : i32
    %c1_i32 = arith.constant 1 : i32
    %12 = arith.addi %11, %c1_i32 : i32
    %13 = arith.xori %10, %12 : i32
    %c16_i32_1 = arith.constant 16 : i32
    %14 = arith.shrui %13, %c16_i32_1 : i32
    %15 = arith.xori %13, %14 : i32
    %c2146121005_i32_2 = arith.constant 2146121005 : i32
    %16 = arith.muli %15, %c2146121005_i32_2 : i32
    %c15_i32_3 = arith.constant 15 : i32
    %17 = arith.shrui %16, %c15_i32_3 : i32
    %18 = arith.xori %16, %17 : i32
    %c-2073254261_i32_4 = arith.constant -2073254261 : i32
    %19 = arith.muli %18, %c-2073254261_i32_4 : i32
    %c16_i32_5 = arith.constant 16 : i32
    %20 = arith.shrui %19, %c16_i32_5 : i32
    %21 = arith.xori %19, %20 : i32
    %22 = tpu.iota {dimensions = array<i32: 0>} : vector<8x128xi32>
    %23 = tpu.iota {dimensions = array<i32: 1>} : vector<8x128xi32>
    %c128_i32 = arith.constant 128 : i32
    %24 = vector.broadcast %c128_i32 : i32 to vector<8x128xi32>
    %25 = arith.muli %22, %24 : vector<8x128xi32>
    %26 = arith.addi %25, %23 : vector<8x128xi32>
    %c2_i32 = arith.constant 2 : i32
    %27 = vector.broadcast %c2_i32 : i32 to vector<8x128xi32>
    %28 = arith.muli %26, %27 : vector<8x128xi32>
    %29 = vector.broadcast %21 : i32 to vector<8x128xi32>
    %30 = arith.xori %28, %29 : vector<8x128xi32>
    %c16_i32_6 = arith.constant 16 : i32
    %31 = vector.broadcast %c16_i32_6 : i32 to vector<8x128xi32>
    %32 = arith.shrui %30, %31 : vector<8x128xi32>
    %33 = arith.xori %30, %32 : vector<8x128xi32>
    %c2146121005_i32_7 = arith.constant 2146121005 : i32
    %34 = vector.broadcast %c2146121005_i32_7 : i32 to vector<8x128xi32>
    %35 = arith.muli %33, %34 : vector<8x128xi32>
    %c15_i32_8 = arith.constant 15 : i32
    %36 = vector.broadcast %c15_i32_8 : i32 to vector<8x128xi32>
    %37 = arith.shrui %35, %36 : vector<8x128xi32>
    %38 = arith.xori %35, %37 : vector<8x128xi32>
    %c-2073254261_i32_9 = arith.constant -2073254261 : i32
    %39 = vector.broadcast %c-2073254261_i32_9 : i32 to vector<8x128xi32>
    %40 = arith.muli %38, %39 : vector<8x128xi32>
    %c16_i32_10 = arith.constant 16 : i32
    %41 = vector.broadcast %c16_i32_10 : i32 to vector<8x128xi32>
    %42 = arith.shrui %40, %41 : vector<8x128xi32>
    %43 = arith.xori %40, %42 : vector<8x128xi32>
    %44 = vector.broadcast %21 : i32 to vector<8x128xi32>
    %45 = arith.addi %43, %44 : vector<8x128xi32>
    %c-1640531527_i32_11 = arith.constant -1640531527 : i32
    %46 = vector.broadcast %c-1640531527_i32_11 : i32 to vector<8x128xi32>
    %47 = arith.addi %45, %46 : vector<8x128xi32>
    %c16_i32_12 = arith.constant 16 : i32
    %48 = vector.broadcast %c16_i32_12 : i32 to vector<8x128xi32>
    %49 = arith.shrui %47, %48 : vector<8x128xi32>
    %50 = arith.xori %47, %49 : vector<8x128xi32>
    %c2146121005_i32_13 = arith.constant 2146121005 : i32
    %51 = vector.broadcast %c2146121005_i32_13 : i32 to vector<8x128xi32>
    %52 = arith.muli %50, %51 : vector<8x128xi32>
    %c15_i32_14 = arith.constant 15 : i32
    %53 = vector.broadcast %c15_i32_14 : i32 to vector<8x128xi32>
    %54 = arith.shrui %52, %53 : vector<8x128xi32>
    %55 = arith.xori %52, %54 : vector<8x128xi32>
    %c-2073254261_i32_15 = arith.constant -2073254261 : i32
    %56 = vector.broadcast %c-2073254261_i32_15 : i32 to vector<8x128xi32>
    %57 = arith.muli %55, %56 : vector<8x128xi32>
    %c16_i32_16 = arith.constant 16 : i32
    %58 = vector.broadcast %c16_i32_16 : i32 to vector<8x128xi32>
    %59 = arith.shrui %57, %58 : vector<8x128xi32>
    %60 = arith.xori %57, %59 : vector<8x128xi32>
    %c8_i32 = arith.constant 8 : i32
    %61 = vector.broadcast %c8_i32 : i32 to vector<8x128xi32>
    %62 = arith.shrui %60, %61 : vector<8x128xi32>
    %63 = arith.sitofp %62 : vector<8x128xi32> to vector<8x128xf32>
    %cst = arith.constant 5.96046448E-8 : f32
    %64 = vector.broadcast %cst : f32 to vector<8x128xf32>
    %65 = arith.mulf %63, %64 : vector<8x128xf32>
    %c1_i32_17 = arith.constant 1 : i32
    %66 = vector.broadcast %c1_i32_17 : i32 to vector<8x128xi32>
    %67 = arith.addi %28, %66 : vector<8x128xi32>
    %68 = vector.broadcast %21 : i32 to vector<8x128xi32>
    %69 = arith.xori %67, %68 : vector<8x128xi32>
    %c16_i32_18 = arith.constant 16 : i32
    %70 = vector.broadcast %c16_i32_18 : i32 to vector<8x128xi32>
    %71 = arith.shrui %69, %70 : vector<8x128xi32>
    %72 = arith.xori %69, %71 : vector<8x128xi32>
    %c2146121005_i32_19 = arith.constant 2146121005 : i32
    %73 = vector.broadcast %c2146121005_i32_19 : i32 to vector<8x128xi32>
    %74 = arith.muli %72, %73 : vector<8x128xi32>
    %c15_i32_20 = arith.constant 15 : i32
    %75 = vector.broadcast %c15_i32_20 : i32 to vector<8x128xi32>
    %76 = arith.shrui %74, %75 : vector<8x128xi32>
    %77 = arith.xori %74, %76 : vector<8x128xi32>
    %c-2073254261_i32_21 = arith.constant -2073254261 : i32
    %78 = vector.broadcast %c-2073254261_i32_21 : i32 to vector<8x128xi32>
    %79 = arith.muli %77, %78 : vector<8x128xi32>
    %c16_i32_22 = arith.constant 16 : i32
    %80 = vector.broadcast %c16_i32_22 : i32 to vector<8x128xi32>
    %81 = arith.shrui %79, %80 : vector<8x128xi32>
    %82 = arith.xori %79, %81 : vector<8x128xi32>
    %83 = vector.broadcast %21 : i32 to vector<8x128xi32>
    %84 = arith.addi %82, %83 : vector<8x128xi32>
    %c-1640531527_i32_23 = arith.constant -1640531527 : i32
    %85 = vector.broadcast %c-1640531527_i32_23 : i32 to vector<8x128xi32>
    %86 = arith.addi %84, %85 : vector<8x128xi32>
    %c16_i32_24 = arith.constant 16 : i32
    %87 = vector.broadcast %c16_i32_24 : i32 to vector<8x128xi32>
    %88 = arith.shrui %86, %87 : vector<8x128xi32>
    %89 = arith.xori %86, %88 : vector<8x128xi32>
    %c2146121005_i32_25 = arith.constant 2146121005 : i32
    %90 = vector.broadcast %c2146121005_i32_25 : i32 to vector<8x128xi32>
    %91 = arith.muli %89, %90 : vector<8x128xi32>
    %c15_i32_26 = arith.constant 15 : i32
    %92 = vector.broadcast %c15_i32_26 : i32 to vector<8x128xi32>
    %93 = arith.shrui %91, %92 : vector<8x128xi32>
    %94 = arith.xori %91, %93 : vector<8x128xi32>
    %c-2073254261_i32_27 = arith.constant -2073254261 : i32
    %95 = vector.broadcast %c-2073254261_i32_27 : i32 to vector<8x128xi32>
    %96 = arith.muli %94, %95 : vector<8x128xi32>
    %c16_i32_28 = arith.constant 16 : i32
    %97 = vector.broadcast %c16_i32_28 : i32 to vector<8x128xi32>
    %98 = arith.shrui %96, %97 : vector<8x128xi32>
    %99 = arith.xori %96, %98 : vector<8x128xi32>
    %c8_i32_29 = arith.constant 8 : i32
    %100 = vector.broadcast %c8_i32_29 : i32 to vector<8x128xi32>
    %101 = arith.shrui %99, %100 : vector<8x128xi32>
    %102 = arith.sitofp %101 : vector<8x128xi32> to vector<8x128xf32>
    %cst_30 = arith.constant 5.96046448E-8 : f32
    %103 = vector.broadcast %cst_30 : f32 to vector<8x128xf32>
    %104 = arith.mulf %102, %103 : vector<8x128xf32>
    %cst_31 = arith.constant 1.000000e+00 : f32
    %105 = vector.broadcast %cst_31 : f32 to vector<8x128xf32>
    %106 = arith.subf %105, %65 : vector<8x128xf32>
    %107 = math.log %106 : vector<8x128xf32>
    %cst_32 = arith.constant -2.000000e+00 : f32
    %108 = vector.broadcast %cst_32 : f32 to vector<8x128xf32>
    %109 = arith.mulf %108, %107 : vector<8x128xf32>
    %110 = math.sqrt %109 : vector<8x128xf32>
    %cst_33 = arith.constant 6.28318548 : f32
    %111 = vector.broadcast %cst_33 : f32 to vector<8x128xf32>
    %112 = arith.mulf %111, %104 : vector<8x128xf32>
    %113 = math.cos %112 : vector<8x128xf32>
    %cst_34 = arith.constant 5.000000e-01 : f32
    %114 = vector.broadcast %cst_34 : f32 to vector<8x128xf32>
    %115 = arith.cmpf olt, %104, %114 : vector<8x128xf32>
    %cst_35 = arith.constant 1.000000e+00 : f32
    %cst_36 = arith.constant -1.000000e+00 : f32
    %116 = vector.broadcast %cst_35 : f32 to vector<8x128xf32>
    %117 = vector.broadcast %cst_36 : f32 to vector<8x128xf32>
    %118 = arith.select %115, %116, %117 : vector<8x128xi1>, vector<8x128xf32>
    %119 = arith.mulf %113, %113 : vector<8x128xf32>
    %cst_37 = arith.constant 1.000000e+00 : f32
    %120 = vector.broadcast %cst_37 : f32 to vector<8x128xf32>
    %121 = arith.subf %120, %119 : vector<8x128xf32>
    %cst_38 = arith.constant 0.000000e+00 : f32
    %122 = vector.broadcast %cst_38 : f32 to vector<8x128xf32>
    %123 = arith.maximumf %121, %122 : vector<8x128xf32>
    %124 = math.sqrt %123 : vector<8x128xf32>
    %125 = arith.mulf %118, %124 : vector<8x128xf32>
    %c0_39 = arith.constant 0 : index
    %c0_40 = arith.constant 0 : index
    %126 = vector.load %arg2[%c0_39, %c0_40] : memref<16x128xf32, #tpu.memory_space<vmem>>, vector<16x128xf32>
    %127 = vector.extract_strided_slice %126 {offsets = [0, 0], sizes = [8, 128], strides = [1, 1]} : vector<16x128xf32> to vector<8x128xf32>
    %128 = arith.mulf %110, %113 : vector<8x128xf32>
    %129 = arith.addf %127, %128 : vector<8x128xf32>
    %c0_41 = arith.constant 0 : index
    %c0_42 = arith.constant 0 : index
    %130 = vector.load %arg3[%c0_41, %c0_42] : memref<16x128xf32, #tpu.memory_space<vmem>>, vector<8x128xf32>
    tpu.vector_store %arg3[%c0_41, %c0_42], %129 {strides = array<i32>} : memref<16x128xf32, #tpu.memory_space<vmem>>, vector<8x128xf32>,
    %131 = vector.extract_strided_slice %126 {offsets = [8, 0], sizes = [8, 128], strides = [1, 1]} : vector<16x128xf32> to vector<8x128xf32>
    %132 = arith.mulf %110, %125 : vector<8x128xf32>
    %133 = arith.addf %131, %132 : vector<8x128xf32>
    %c8 = arith.constant 8 : index
    %c0_43 = arith.constant 0 : index
    %134 = vector.load %arg3[%c8, %c0_43] : memref<16x128xf32, #tpu.memory_space<vmem>>, vector<8x128xf32>
    tpu.vector_store %arg3[%c8, %c0_43], %133 {strides = array<i32>} : memref<16x128xf32, #tpu.memory_space<vmem>>, vector<8x128xf32>,
    return
  }
  func.func @transform_0(%arg0: i32, %arg1: memref<1xi32, #tpu.memory_space<smem>>) -> (i32, i32) {
    %c0_i32 = arith.constant 0 : i32
    %c0_i32_0 = arith.constant 0 : i32
    return %arg0, %c0_i32 : i32, i32
  }
  func.func @transform_1(%arg0: i32, %arg1: memref<1xi32, #tpu.memory_space<smem>>) -> (i32, i32) {
    %c0_i32 = arith.constant 0 : i32
    %c0_i32_0 = arith.constant 0 : i32
    return %arg0, %c0_i32 : i32, i32
  }
}

</mosaic_0001>

<bundles_post_ra>
// kernel: tpu_custom_call.1
= control target key start
LH: loop header
LB: loop body
LE: loop exit
PB: predicated region body
PF: predicated region fallthrough
CT: control target
= control target key end

     0   :  { %8 = vsyncpa [#allocation5], 0  ;;  %s417_s0 = inlined_call_operand.<no memory space> [shape: s32[1], index: 0, kind: input, shape index: {}]   ;;  %s418_s1 = inlined_call_operand.hbm [shape: f32[16,128], index: 1, kind: input, shape index: {}]   ;;  %s419_s2 = inlined_call_operand.hbm [shape: f32[16,128], index: 2, kind: output, shape index: {}]  }
   0x1   :  { %9 = vsyncpa [#allocation6], 0  ;;  %s330_s9 = smov [#allocation4]   ;;  %s282_s13 = scalar_lea.hbm %s418_s1, 256 }
   0x2   :  { %s15_s10 = sshll.u32 %s330_s9, 4  ;;  %p283_p0 = scmp.ne.s32.totalorder %s418_s1, %s282_s13  ;;  %s16_s10 = int_to_ptr.vmem [resolvable:$true] %s15_s10 }
   0x3   :  { %p286_p1 = scmp.lt.u32.totalorder %s282_s13, %s418_s1 }
   0x5   :  { %p288_p2 = pnand %p286_p1, %p283_p0 }
   0x7   :  { %291 = shalt.err (!%p288_p2)
}
   0x8   :  { %s292_s18 = scalar_lea.vmem %s16_s10, 256  ;;  %p297_p4 = scmp.lt.s32.totalorder %s16_s10, %s16_s10 }
   0x9   :  { %p293_p3 = scmp.ne.s32.totalorder %s16_s10, %s292_s18  ;;  %p298_p5 = scmp.lt.s32.totalorder %s292_s18, %s292_s18 }
   0xb   :  { %p299_p6 = por %p298_p5, %p297_p4 }
   0xd   :  { %p300_p7 = pnand %p299_p6, %p293_p3 }
   0xf   :  { %303 = shalt.err (!%p300_p7)
}
  0x10   :  { %s331_s19 = smov 128   ;;  %s332_s20 = smov 8  }
  0x11   :  { %21 = dma.hbm_to_vmem [thread:$0]  %s418_s1, 256, %s16_s10, [#allocation5], %s331_s19, %s331_s19, %s332_s20  }
  0x12   :  { %326 = dma.done.wait [#allocation5], 256  }
  0x13   :  { %327 = vsyncadd [#allocation5], 4294967040  ;;  %s26_s25 = smul.u32 2654435769, %s417_s0  ;;  %v47_v0 = vlaneseq  ;;  %v333_v58 = vmov 683565275  }
  0x14   :  { %v334_v60 = vmov 2475754826   ;;  %v335_v62 = vmov 2131351028   ;;  %s340_s14 = smov [#allocation7]  }
  0x15   :  { %s27_s26 = sadd.s32 2246822507, %s26_s25  ;;  %v48_v1 = vshrl.u32 %v47_v0, 7  ;;  %v50_v2 = vand.u32 127, %v47_v0  ;;  %s241_s15 = sshll.u32 %s340_s14, 4  ;;  %s242_s15 = int_to_ptr.vmem [resolvable:$true] %s241_s15 }
  0x16   :  { %s28_s27 = sshrl.u32 %s27_s26, 16  ;;  %s304_s16 = scalar_lea.vmem %s242_s15, 256 }
  0x17   :  { %s29_s28 = sxor.u32 %s28_s27, %s27_s26  ;;  %v51_v3 = vmul.u32 128, %v48_v1  ;;  %p305_p8 = scmp.ne.s32.totalorder %s242_s15, %s304_s16 }
  0x18   :  { %s30_s29 = smul.u32 2146121005, %s29_s28  ;;  %p309_p9 = scmp.lt.s32.totalorder %s242_s15, %s242_s15 }
  0x19   :  { %v52_v4 = vadd.s32 %v51_v3, %v50_v2  ;;  %v336_v3 = vmov 2102212464   ;;  %p310_p10 = scmp.lt.s32.totalorder %s304_s16, %s304_s16 }
  0x1a   :  { %s31_s30 = sshrl.u32 %s30_s29, 15 }
  0x1b   :  { %s32_s3 = sxor.u32 %s31_s30, %s30_s29  ;;  %v53_v5 = vmul.u32 2, %v52_v4  ;;  %p311_p11 = por %p310_p10, %p309_p9 }
  0x1c   :  { %s33_s4 = smul.u32 2221713035, %s32_s3 }
  0x1d   :  { %v77_v6 = vadd.s32 1, %v53_v5  ;;  %p312_p12 = pnand %p311_p11, %p305_p8 }
  0x1e   :  { %s34_s5 = sshrl.u32 %s33_s4, 16 }
  0x1f   :  { %s35_s6 = sxor.u32 %s34_s5, %s33_s4 }
  0x20   :  { %s38_s1 = sxor.u32 1, %s35_s6 }
  0x21   :  { %s39_s7 = sshrl.u32 %s38_s1, 16 }
  0x22   :  { %s40_s8 = sxor.u32 %s39_s7, %s38_s1 }
  0x23   :  { %s41_s9 = smul.u32 2146121005, %s40_s8 }
  0x25   :  { %s42_s0 = sshrl.u32 %s41_s9, 15 }
  0x26   :  { %s43_s10 = sxor.u32 %s42_s0, %s41_s9 }
  0x27   :  { %s44_s11 = smul.u32 2221713035, %s43_s10 }
  0x29   :  { %s45_s12 = sshrl.u32 %s44_s11, 16 }
  0x2a   :  { %s46_s13 = sxor.u32 %s45_s12, %s44_s11 }
  0x2b   :  { %v54_v7 = vstv %s46_s13 }
  0x2c   :  { %v55_v8 = vxor.u32 %v54_v7, %v53_v5  ;;  %v78_v9 = vxor.u32 %v77_v6, %v54_v7 }
  0x2e   :  { %v56_v10 = vshrl.u32 %v55_v8, 16  ;;  %v79_v11 = vshrl.u32 %v78_v9, 16 }
  0x30   :  { %v57_v12 = vxor.u32 %v56_v10, %v55_v8  ;;  %v80_v13 = vxor.u32 %v79_v11, %v78_v9  ;;  %v337_v8 = vmov 920167782  }
  0x32   :  { %v58_v14 = vmul.u32 2146121005, %v57_v12  ;;  %v81_v15 = vmul.u32 2146121005, %v80_v13 }
  0x34   :  { %v59_v16 = vshrl.u32 %v58_v14, 15  ;;  %v82_v17 = vshrl.u32 %v81_v15, 15 }
  0x36   :  { %v83_v18 = vxor.u32 %v82_v17, %v81_v15  ;;  %v60_v19 = vxor.u32 %v59_v16, %v58_v14  ;;  %v338_v14 = vmov 1326507024  }
  0x38   :  { %v84_v20 = vmul.u32 2221713035, %v83_v18  ;;  %v61_v22 = vmul.u32 2221713035, %v60_v19 }
  0x3a   :  { %v85_v21 = vshrl.u32 %v84_v20, 16  ;;  %v62_v25 = vshrl.u32 %v61_v22, 16 }
  0x3c   :  { %v86_v23 = vxor.u32 %v85_v21, %v84_v20  ;;  %v63_v28 = vxor.u32 %v62_v25, %v61_v22 }
  0x3e   :  { %v87_v24 = vadd.s32 %v86_v23, %v54_v7  ;;  %v64_v31 = vadd.s32 %v63_v28, %v54_v7 }
  0x40   :  { %v88_v26 = vadd.s32 2654435769, %v87_v24  ;;  %v65_v34 = vadd.s32 2654435769, %v64_v31 }
  0x42   :  { %v89_v27 = vshrl.u32 %v88_v26, 16  ;;  %v66_v37 = vshrl.u32 %v65_v34, 16 }
  0x44   :  { %v90_v29 = vxor.u32 %v89_v27, %v88_v26  ;;  %v67_v40 = vxor.u32 %v66_v37, %v65_v34 }
  0x46   :  { %v91_v30 = vmul.u32 2146121005, %v90_v29  ;;  %v68_v43 = vmul.u32 2146121005, %v67_v40 }
  0x48   :  { %v92_v32 = vshrl.u32 %v91_v30, 15  ;;  %v69_v46 = vshrl.u32 %v68_v43, 15 }
  0x4a   :  { %v93_v33 = vxor.u32 %v92_v32, %v91_v30  ;;  %v70_v49 = vxor.u32 %v69_v46, %v68_v43 }
  0x4c   :  { %v94_v35 = vmul.u32 2221713035, %v93_v33  ;;  %v71_v52 = vmul.u32 2221713035, %v70_v49 }
  0x4e   :  { %v95_v36 = vshrl.u32 %v94_v35, 16  ;;  %v72_v0 = vshrl.u32 %v71_v52, 16 }
  0x50   :  { %v96_v38 = vxor.u32 %v95_v36, %v94_v35  ;;  %v73_v16 = vxor.u32 %v72_v0, %v71_v52 }
  0x52   :  { %v97_v39 = vshrl.u32 %v96_v38, 8  ;;  %v74_v28 = vshrl.u32 %v73_v16, 8 }
  0x54   :  { %v98_v41 = vcvt.s32.f32 %v97_v39  ;;  %v75_v38 = vcvt.s32.f32 %v74_v28 }
  0x56   :  { %v374_v42 = vmul.f32 5.9604645e-08, %v98_v41  ;;  %v76_v43 = vmul.f32 5.9604645e-08, %v75_v38 }
  0x58   :  { %v377_v44 = vmul.f32 6.2831855, %v374_v42  ;;  %vm215_vm15 = vcmp.lt.f32.partialorder %v374_v42, 0.5 }
  0x5a   :  { %v115_v45 = vand.u32 2139095040, %v377_v44  ;;  %v112_v51 = vand.u32 2147483647, %v377_v44  ;;  %vm114_vm7 = vcmp.lt.s32.totalorder %v377_v44, 0  ;;  %vm204_vm14 = vweird.f32 %v377_v44 }
  0x5c   :  { %v116_v47 = vshrl.u32 %v115_v45, 23  ;;  %v119_v55 = vand.u32 8388607, %v112_v51  ;;  %vm113_vm8 = vcmp.le.f32.partialorder %v112_v51, 0.7853982 }
  0x5e   :  { %v253_v48 = vadd.s32 4294967169, %v116_v47  ;;  %v120_v6 = vor.u32 8388608, %v119_v55  ;;  %v100_v47 = vsub.f32 1.0, %v76_v43 }
  0x60   :  { %v122_v50 = vadd.s32 1, %v253_v48  ;;  %v160_v21 = vshll.u32 %v120_v6, 8  ;;  %272 = vlog2.f32 %v100_v47 }
  0x62   :  { %vm123_vm0 = vcmp.gt.s32.totalorder %v122_v50, 0 }
  0x63   :  { %v124_v53 = vsel %vm123_vm0, %v122_v50, 0 }
  0x64   :  { %v126_v54 = vand.u32 31, %v124_v53  ;;  %v125_v56 = vshrl.u32 %v124_v53, 5 }
  0x66   :  { %v127_v57 = vsub.s32 32, %v126_v54  ;;  %v129_v59 = vshll.u32 %v333_v58, %v126_v54  ;;  %v132_v61 = vshll.u32 %v334_v60, %v126_v54  ;;  %v135_v63 = vshll.u32 %v335_v62, %v126_v54 }
  0x67   :  { %v138_v5 = vshll.u32 %v336_v3, %v126_v54  ;;  %v141_v9 = vshll.u32 %v337_v8, %v126_v54  ;;  %vm144_vm1 = vcmp.lt.s32.totalorder %v125_v56, 1  ;;  %vm147_vm2 = vcmp.lt.s32.totalorder %v125_v56, 4 }
  0x68   :  { %v130_v1 = vshrl.u32 %v334_v60, %v127_v57  ;;  %v133_v2 = vshrl.u32 %v335_v62, %v127_v57  ;;  %v136_v4 = vshrl.u32 %v336_v3, %v127_v57  ;;  %v128_v7 = vshrl.u32 %v333_v58, %v127_v57 }
  0x69   :  { %v139_v13 = vshrl.u32 %v337_v8, %v127_v57  ;;  %v142_v15 = vshrl.u32 %v338_v14, %v127_v57  ;;  %vm146_vm3 = vcmp.lt.s32.totalorder %v125_v56, 3  ;;  %vm145_vm4 = vcmp.lt.s32.totalorder %v125_v56, 2 }
  0x6a   :  { %v131_v10 = vor.u32 %v130_v1, %v129_v59  ;;  %v134_v11 = vor.u32 %v133_v2, %v132_v61  ;;  %v137_v12 = vor.u32 %v136_v4, %v135_v63  ;;  %v273_v56 = vpop.eup %272 }
  0x6b   :  { %v140_v17 = vor.u32 %v139_v13, %v138_v5  ;;  %v143_v19 = vor.u32 %v142_v15, %v141_v9  ;;  %v102_v61 = vmul.f32 0.6931472, %v273_v56 }
  0x6c   :  { %v149_v18 = vsel %vm147_vm2, %v137_v12, 2102212464  ;;  %v152_v20 = vsel %vm144_vm1, %v131_v10, %v134_v11  ;;  %v148_v22 = vsel %vm144_vm1, %v128_v7, %v131_v10  ;;  %v156_v25 = vsel %vm144_vm1, %v134_v11, %v137_v12 }
  0x6d   :  { %v150_v23 = vsel %vm146_vm3, %v134_v11, %v149_v18  ;;  %v153_v24 = vsel %vm147_vm2, %v140_v17, 920167782  ;;  %v157_v27 = vsel %vm147_vm2, %v143_v19, 1326507024  ;;  %v103_v2 = vmul.f32 -2.0, %v102_v61 }
  0x6e   :  { %v154_v26 = vsel %vm146_vm3, %v137_v12, %v153_v24  ;;  %v158_v30 = vsel %vm146_vm3, %v140_v17, %v157_v27  ;;  %v151_v31 = vsel %vm145_vm4, %v148_v22, %v150_v23 }
  0x6f   :  { %v155_v29 = vsel %vm145_vm4, %v152_v20, %v154_v26  ;;  %v159_v32 = vsel %vm145_vm4, %v156_v25, %v158_v30  ;;  %v167_v37 = vmul.u32 %v160_v21, %v151_v31  ;;  %274 = vrsqrt.f32 %v103_v2  ;;  %v228_v26 = vld [vmem:[#allocation4] sm:$0xff] }
  0x70   :  { %v386_v33 = vmul.u32.u64.low %v160_v21, %v155_v29  ;;  %v387_v34 = vmul.u32.u64.high %v160_v21, %v155_v29, %v386_v33  ;;  %v389_v35 = vmul.u32.u64.low %v160_v21, %v159_v32  ;;  %v390_v36 = vmul.u32.u64.high %v160_v21, %v159_v32, %v389_v35 }
  0x71   :  { %vm106_vm9 = vcmp.eq.f32.partialorder %v103_v2, inf  ;;  %v109_v17 = vand.u32 2147483648, %v103_v2  ;;  %vm108_vm11 = vcmp.eq.f32.partialorder %v103_v2, 0.0 }
  0x72   :  { %v170_v39 = vadd.s32 1, %v387_v34  ;;  %vm169_vm5 = vc.u32 %v390_v36, %v386_v33  ;;  %v168_v55 = vadd.s32 %v386_v33, %v390_v36 }
  0x74   :  { %v171_v40 = vsel %vm169_vm5, %v170_v39, %v387_v34  ;;  %v229_v39 = vld [vmem:[#allocation4 + $0x8] sm:$0xff] }
  0x75   :  { %v172_v41 = vadd.s32 %v171_v40, %v167_v37 }
  0x77   :  { %v173_v45 = vadd.s32 536870912, %v172_v41 }
  0x79   :  { %v174_v46 = vshrl.u32 %v173_v45, 30  ;;  %v275_v13 = vpop.eup %274 }
  0x7a   :  { %v105_v15 = vmul.f32 %v275_v13, %v103_v2 }
  0x7b   :  { %v175_v48 = vshll.u32 %v174_v46, 30  ;;  %v198_v8 = vsub.s32 4, %v174_v46 }
  0x7c   :  { %v107_v19 = vsel %vm106_vm9, %v103_v2, %v105_v15 }
  0x7d   :  { %v176_v49 = vsub.s32 %v172_v41, %v175_v48  ;;  %v199_v11 = vsel %vm114_vm7, %v198_v8, %v174_v46  ;;  %v110_v22 = vsel %vm108_vm11, %v109_v17, %v107_v19 }
  0x7e   :  { %v201_v12 = vsel %vm113_vm8, 0, %v199_v11 }
  0x7f   :  { %v178_v50 = vsub.s32 0, %v176_v49  ;;  %v205_v14 = vand.u32 3, %v201_v12 }
  0x81   :  { %v254_v52 = vmin.u32 %v178_v50, %v176_v49  ;;  %vm210_vm10 = vcmp.eq.s32.totalorder %v205_v14, 2  ;;  %vm207_vm12 = vcmp.eq.s32.totalorder %v205_v14, 0  ;;  %vm206_vm13 = vcmp.lt.s32.totalorder %v205_v14, 2 }
  0x83   :  { %v180_v53 = vclz %v254_v52 }
  0x85   :  { %v255_v54 = vadd.s32 4294967294, %v180_v53 }
  0x87   :  { %vm256_vm6 = vcmp.lt.s32.totalorder %v255_v54, 0 }
  0x88   :  { %v183_v57 = vsel %vm256_vm6, 0, %v255_v54 }
  0x89   :  { %v184_v58 = vsub.s32 32, %v183_v57  ;;  %v185_v59 = vshll.u32 %v176_v49, %v183_v57  ;;  %v188_v60 = vsub.s32 4294967266, %v183_v57 }
  0x8b   :  { %v186_v62 = vshrl.u32 %v168_v55, %v184_v58  ;;  %v189_v63 = vadd.s32 127, %v188_v60 }
  0x8d   :  { %v187_v0 = vor.u32 %v186_v62, %v185_v59  ;;  %v190_v1 = vshll.u32 %v189_v63, 23 }
  0x8f   :  { %v191_v3 = vor.u32 4788187, %v190_v1  ;;  %v194_v4 = vcvt.s32.f32 %v187_v0 }
  0x91   :  { %v192_v5 = vand.u32 2147483647, %v191_v3 }
  0x93   :  { %v195_v6 = vmul.f32 %v194_v4, %v192_v5 }
  0x95   :  { %v196_v7 = vxor.u32 2147483648, %v195_v6 }
  0x97   :  { %v197_v9 = vsel %vm114_vm7, %v196_v7, %v195_v6 }
  0x98   :  { %v200_v10 = vsel %vm113_vm8, %v377_v44, %v197_v9  ;;  %v339_v44 = vmov -1.0  }
  0x99   :  { %276 = vcosq.f32 %v200_v10  ;;  %v216_v35 = vsel %vm215_vm15, 1.0, %v339_v44 }
  0x9a   :  { %278 = vsinq.f32 %v200_v10 }
  0xa3   :  { %v277_v16 = vpop.eup %276 }
  0xa4   :  { %v279_v18 = vpop.eup %278  ;;  %v211_v51 = vxor.u32 2147483648, %v277_v16 }
  0xa5   :  { %v208_v20 = vxor.u32 2147483648, %v279_v18 }
  0xa6   :  { %v212_v21 = vsel %vm210_vm10, %v211_v51, %v279_v18 }
  0xa7   :  { %v209_v23 = vsel %vm207_vm12, %v277_v16, %v208_v20 }
  0xa8   :  { %v213_v24 = vsel %vm206_vm13, %v209_v23, %v212_v21 }
  0xa9   :  { %v214_v25 = vsel %vm204_vm14, nan, %v213_v24 }
  0xaa   :  { %v217_v27 = vmul.f32 %v214_v25, %v214_v25  ;;  %v230_v28 = vmul.f32 %v214_v25, %v110_v22 }
  0xac   :  { %v218_v29 = vsub.f32 1.0, %v217_v27  ;;  %v231_v30 = vadd.f32 %v230_v28, %v228_v26 }
  0xae   :  { %v219_v31 = vmax.f32 %v218_v29, 0.0  ;;  %232 = vst [vmem:[#allocation7] sm:$0xff] %v231_v30 }
  0xb0   :  { %280 = vrsqrt.f32 %v219_v31  ;;  %vm222_vm0 = vcmp.eq.f32.partialorder %v219_v31, inf  ;;  %v225_v33 = vand.u32 2147483648, %v219_v31  ;;  %vm224_vm1 = vcmp.eq.f32.partialorder %v219_v31, 0.0 }
  0xba   :  { %v281_v32 = vpop.eup %280 }
  0xbb   :  { %v221_v34 = vmul.f32 %v281_v32, %v219_v31 }
  0xbd   :  { %v223_v36 = vsel %vm222_vm0, %v219_v31, %v221_v34 }
  0xbe   :  { %v226_v37 = vsel %vm224_vm1, %v225_v33, %v223_v36 }
  0xbf   :  { %v227_v38 = vmul.f32 %v226_v37, %v216_v35 }
  0xc1   :  { %v233_v40 = vmul.f32 %v227_v38, %v110_v22 }
  0xc3   :  { %v234_v41 = vadd.f32 %v233_v40, %v229_v39 }
  0xc5   :  { %235 = vst [vmem:[#allocation7 + $0x8] sm:$0xff] %v234_v41 }
  0xc6   :  { %315 = shalt.err (!%p312_p12)
}
  0xc7   :  { %s316_s21 = scalar_lea.hbm %s419_s2, 256 }
  0xc8   :  { %p317_p13 = scmp.ne.s32.totalorder %s419_s2, %s316_s21  ;;  %p320_p0 = scmp.lt.u32.totalorder %s316_s21, %s419_s2 }
  0xca   :  { %p322_p1 = pnand %p320_p0, %p317_p13 }
  0xcc   :  { %325 = shalt.err (!%p322_p1)
}
  0xcd   :  { %247 = dma.vmem_to_hbm [thread:$0]  %s242_s15, 256, %s419_s2, [#allocation6], %s331_s19, %s331_s19, %s332_s20  }
  0xce   :  { %328 = dma.done.wait [#allocation6], 256  }
  0xcf   :  { %329 = vsyncadd [#allocation6], 4294967040 }
  0xd0   :  { %251 = vsyncpa [#allocation5], 1 }
  0xd1   :  { %252 = vsyncpa [#allocation6], 1 }

</bundles_post_ra>
